<compile_context>
chip_gen: v7x
topology: tpu7x:2x2x1
jax: 0.10.0
libtpu: 0.0.40
codegen_flags: <defaults>
</compile_context>

<pallas_src>
import functools

import jax
import jax.numpy as jnp
from jax import lax
from jax.experimental import pallas as pl
from jax.experimental.pallas import tpu as pltpu


def _vmlmf_lstm_kernel(
    hidden_size, chunk, total_steps,
    # inputs
    gx_ref, h0_ref, c0_ref, u_full_ref,
    # outputs
    hc_out_ref,
    # scratch (persistent across grid steps)
    h_s, c_s,
):
    H = hidden_size
    ci = pl.program_id(0)

    # Load initial state into VMEM-resident scratch at the first chunk.
    @pl.when(ci == 0)
    def _():
        h_s[...] = h0_ref[...]
        c_s[...] = c0_ref[...]

    u_full = u_full_ref[...]            # (H, 4H) f32, VMEM-resident (loop-invariant)
    base = ci * chunk                   # global timestep offset of this chunk
    needs_mask = (total_steps % chunk) != 0   # static: mask only if padded

    def step(s, carry):
        h, c = carry
        # Truly recurrent work only: one MXU dot + elementwise gate math.
        # gate_x (input projection + bias, c-gate pre-scaled by 2) is read
        # per-step straight from the chunk's VMEM block.
        gates = (
            jnp.dot(h, u_full, preferred_element_type=jnp.float32) + gx_ref[s]
        )                                                           # (B, 4H)
        sg = jax.nn.sigmoid(gates)       # one EUP launch over the 128-lane slab
        i_g = sg[:, 0:H]
        f_g = sg[:, H:2 * H]
        o_g = sg[:, 2 * H:3 * H]
        c_tilda = 2.0 * sg[:, 3 * H:4 * H] - 1.0   # tanh via pre-scaled sigmoid
        c_next = f_g * c + i_g * c_tilda
        h_next = o_g * jnp.tanh(c_next)
        if needs_mask:
            valid = (base + s) < total_steps
            h_next = jnp.where(valid, h_next, h)
            c_next = jnp.where(valid, c_next, c)
        return (h_next, c_next)

    h_fin, c_fin = lax.fori_loop(
        0, chunk, step, (h_s[...], c_s[...]), unroll=min(4, chunk)
    )

    h_s[...] = h_fin
    c_s[...] = c_fin

    # Single [B, 2H] store of the final state (written once, negligible).
    @pl.when(ci == pl.num_programs(0) - 1)
    def _():
        hc_out_ref[...] = jnp.concatenate([h_fin, c_fin], axis=1).astype(
            hc_out_ref.dtype
        )


def _pack_params(params):
    """Fuse VMLMF parameters into MXU-friendly slabs.

    Returns (Wfull, Ufull, b4):
      Wfull = w @ [w1|w2|w3|w4]  : (input_size, 4H)
      Ufull = u @ [u1|u2|u3|u4]  : (hidden_size, 4H)
      b4    = [b_i|b_f|b_o|b_c]  : (1, 4H)
    Gate column order is [i | f | o | c]; the c-gate columns (and bias) are
    pre-scaled by 2 so tanh(z) can be recovered as 2*sigmoid(2z) - 1.
    """
    H = params["w1"].shape[1]
    W4 = jnp.concatenate(
        [params["w1"], params["w2"], params["w3"], params["w4"]], axis=1)
    U4 = jnp.concatenate(
        [params["u1"], params["u2"], params["u3"], params["u4"]], axis=1)
    b4 = jnp.concatenate(
        [params["bias_i"], params["bias_f"], params["bias_o"], params["bias_c"]],
        axis=1)
    scale = jnp.concatenate(
        [jnp.ones((1, 3 * H), jnp.float32), jnp.full((1, H), 2.0, jnp.float32)],
        axis=1)
    w_full = (params["w"] @ W4) * scale      # (I, 4H)
    u_full = (params["u"] @ U4) * scale      # (H, 4H)
    b4 = b4 * scale                          # (1, 4H)
    return w_full, u_full, b4


@functools.partial(jax.jit, static_argnames=("chunk",))
def my_lstm_sequence(x_seq, h0, c0, params, chunk=128):
    """Run the VMLMF LSTM cell over x_seq of shape [T, batch, input_size].

    The input projection (+bias) is hoisted out as one parallel matmul; the
    recurrence runs inside a single pallas_call with the time axis chunked.
    Returns (h_T, c_T).
    """
    T, B, I = x_seq.shape
    H = h0.shape[1]
    w_full, u_full, b4 = _pack_params(params)

    # Hoisted, parallel-over-T input projection with bias folded in: (T,B,4H).
    gate_x = (x_seq.reshape(T * B, I) @ w_full + b4).reshape(T, B, 4 * H)

    TC = min(chunk, T)                       # timesteps per grid step (static)
    n_chunks = pl.cdiv(T, TC)
    t_pad = n_chunks * TC
    if t_pad != T:                           # pad; padded steps masked in-kernel
        gate_x = jnp.pad(gate_x, ((0, t_pad - T), (0, 0), (0, 0)))

    kernel = functools.partial(_vmlmf_lstm_kernel, H, TC, T)

    hc = pl.pallas_call(
        kernel,
        out_shape=jax.ShapeDtypeStruct((B, 2 * H), jnp.float32),
        grid=(n_chunks,),
        in_specs=[
            # One (TC, B, 4H) lane-dense chunk of precomputed gate_x per step.
            pl.BlockSpec((TC, B, 4 * H), lambda c: (c, 0, 0)),
            pl.BlockSpec((B, H), lambda c: (0, 0)),        # h0 (constant block)
            pl.BlockSpec((B, H), lambda c: (0, 0)),        # c0 (constant block)
            pl.BlockSpec((H, 4 * H), lambda c: (0, 0)),    # Ufull, VMEM-resident
        ],
        out_specs=pl.BlockSpec((B, 2 * H), lambda c: (0, 0)),
        scratch_shapes=[
            pltpu.VMEM((B, H), jnp.float32),   # h state (carried across chunks)
            pltpu.VMEM((B, H), jnp.float32),   # c state
        ],
        compiler_params=pltpu.CompilerParams(
            # True recurrence over time: must stay "arbitrary" (sequential).
            dimension_semantics=("arbitrary",),
        ),
    )(gate_x, h0, c0, u_full)

    return hc[:, :H], hc[:, H:]


def my_lstm_cell(x, h, c, params):
    """Single-step MyLSTMCell.forward (module semantics). Returns (h_next, c_next)."""
    return my_lstm_sequence(x[None], h, c, params)


def init_params(key, input_size, hidden_size, w_rank, u_rank):
    """Deterministic parameter init matching MyLSTMCell.__init__ (low-rank path)."""
    keys = jax.random.split(key, 10)
    return {
        "w":  0.1 * jax.random.normal(keys[0], (input_size, w_rank), jnp.float32),
        "w1": 0.1 * jax.random.normal(keys[1], (w_rank, hidden_size), jnp.float32),
        "w2": 0.1 * jax.random.normal(keys[2], (w_rank, hidden_size), jnp.float32),
        "w3": 0.1 * jax.random.normal(keys[3], (w_rank, hidden_size), jnp.float32),
        "w4": 0.1 * jax.random.normal(keys[4], (w_rank, hidden_size), jnp.float32),
        "u":  0.1 * jax.random.normal(keys[5], (hidden_size, u_rank), jnp.float32),
        "u1": 0.1 * jax.random.normal(keys[6], (u_rank, hidden_size), jnp.float32),
        "u2": 0.1 * jax.random.normal(keys[7], (u_rank, hidden_size), jnp.float32),
        "u3": 0.1 * jax.random.normal(keys[8], (u_rank, hidden_size), jnp.float32),
        "u4": 0.1 * jax.random.normal(keys[9], (u_rank, hidden_size), jnp.float32),
        "bias_f": jnp.ones((1, hidden_size), jnp.float32),
        "bias_i": jnp.ones((1, hidden_size), jnp.float32),
        "bias_c": jnp.ones((1, hidden_size), jnp.float32),
        "bias_o": jnp.ones((1, hidden_size), jnp.float32),
    }


def reference_forward(x, h, c, p):
    """Pure-JAX mirror of MyLSTMCell.forward (low-rank path) for verification."""
    xw = x @ p["w"]
    hu = h @ p["u"]
    mi = xw @ p["w1"] + hu @ p["u1"]
    mf = xw @ p["w2"] + hu @ p["u2"]
    mo = xw @ p["w3"] + hu @ p["u3"]
    mc = xw @ p["w4"] + hu @ p["u4"]
    i = jax.nn.sigmoid(mi + p["bias_i"])
    f = jax.nn.sigmoid(mf + p["bias_f"])
    o = jax.nn.sigmoid(mo + p["bias_o"])
    c_tilda = jnp.tanh(mc + p["bias_c"])
    c_next = f * c + i * c_tilda
    h_next = o * jnp.tanh(c_next)
    return h_next, c_next


@jax.jit
def reference_sequence(x_seq, h0, c0, p):
    def step(carry, x):
        h, c = carry
        h, c = reference_forward(x, h, c, p)
        return (h, c), None
    (hT, cT), _ = lax.scan(step, (h0, c0), x_seq)
    return hT, cT


if __name__ == "__main__":
    batch = 8
    input_size = 16
    hidden_size = 32
    w_rank = 8
    u_rank = 8

    key = jax.random.PRNGKey(0)
    k_x, k_h, k_c, k_p = jax.random.split(key, 4)

    seq_len_long = 300           # exercises chunking + remainder masking (TC=128)
    x_seq = jax.random.normal(
        k_x, (seq_len_long, batch, input_size), jnp.float32)
    h0 = jax.random.normal(k_h, (batch, hidden_size), jnp.float32)
    c0 = jax.random.normal(k_c, (batch, hidden_size), jnp.float32)
    params = init_params(k_p, input_size, hidden_size, w_rank, u_rank)

    # --- Single-step check (exact module semantics) -------------------------
    h1, c1 = my_lstm_cell(x_seq[0], h0, c0, params)
    jax.block_until_ready((h1, c1))
    h1_ref, c1_ref = reference_forward(x_seq[0], h0, c0, params)
    assert jnp.allclose(h1, h1_ref, atol=1e-4, rtol=1e-4)
    assert jnp.allclose(c1, c1_ref, atol=1e-4, rtol=1e-4)

    # --- Short-sequence check (single chunk, no padding) ---------------------
    hS, cS = my_lstm_sequence(x_seq[:6], h0, c0, params)
    jax.block_until_ready((hS, cS))
    hS_ref, cS_ref = reference_sequence(x_seq[:6], h0, c0, params)
    assert jnp.allclose(hS, hS_ref, atol=2e-4, rtol=2e-4)
    assert jnp.allclose(cS, cS_ref, atol=2e-4, rtol=2e-4)

    # --- Long-sequence check (3 chunks of 128, last chunk masked) ------------
    hT, cT = my_lstm_sequence(x_seq, h0, c0, params, chunk=128)
    jax.block_until_ready((hT, cT))
    hT_ref, cT_ref = reference_sequence(x_seq, h0, c0, params)
    assert jnp.allclose(hT, hT_ref, atol=1e-3, rtol=1e-3)
    assert jnp.allclose(cT, cT_ref, atol=1e-3, rtol=1e-3)

    print("KERNEL_OK")
</pallas_src>

<mosaic_0001>
module attributes {stable_mosaic.version = 11 : i64} {
  func.func @_vmlmf_lstm_kernel(%arg0: i32, %arg1: memref<1x8x128xf32, #tpu.memory_space<vmem>>, %arg2: memref<8x32xf32, #tpu.memory_space<vmem>>, %arg3: memref<8x32xf32, #tpu.memory_space<vmem>>, %arg4: memref<32x128xf32, #tpu.memory_space<vmem>>, %arg5: memref<8x64xf32, #tpu.memory_space<vmem>>, %arg6: memref<8x32xf32, #tpu.memory_space<vmem>>, %arg7: memref<8x32xf32, #tpu.memory_space<vmem>>) attributes {dimension_semantics = [#tpu.dimension_semantics<arbitrary>], iteration_bounds = array<i64: 1>, scalar_prefetch = 0 : i64, scratch_operands = 2 : i64, tpu.core_type = #tpu.core_type<tc>, window_params = [{transform_indices = @transform_0, window_bounds = array<i64: 1, 8, 128>}, {pipeline_mode = #tpu.pipeline_mode<synchronous>, transform_indices = @transform_1, window_bounds = array<i64: 8, 32>}, {pipeline_mode = #tpu.pipeline_mode<synchronous>, transform_indices = @transform_2, window_bounds = array<i64: 8, 32>}, {pipeline_mode = #tpu.pipeline_mode<synchronous>, transform_indices = @transform_3, window_bounds = array<i64: 32, 128>}, {pipeline_mode = #tpu.pipeline_mode<synchronous>, transform_indices = @transform_4, window_bounds = array<i64: 8, 64>}]} {
    %c0_i32 = arith.constant 0 : i32
    %0 = arith.cmpi eq, %arg0, %c0_i32 : i32
    %1 = arith.extui %0 : i1 to i32
    %c0_i32_0 = arith.constant 0 : i32
    %2 = arith.cmpi ne, %1, %c0_i32_0 : i32
    scf.if %2 {
      %c0_18 = arith.constant 0 : index
      %c0_19 = arith.constant 0 : index
      %34 = vector.load %arg2[%c0_18, %c0_19] : memref<8x32xf32, #tpu.memory_space<vmem>>, vector<8x32xf32>
      %c0_20 = arith.constant 0 : index
      %c0_21 = arith.constant 0 : index
      %35 = vector.load %arg6[%c0_20, %c0_21] : memref<8x32xf32, #tpu.memory_space<vmem>>, vector<8x32xf32>
      tpu.vector_store %arg6[%c0_20, %c0_21], %34 {strides = array<i32>} : memref<8x32xf32, #tpu.memory_space<vmem>>, vector<8x32xf32>,
      %c0_22 = arith.constant 0 : index
      %c0_23 = arith.constant 0 : index
      %36 = vector.load %arg3[%c0_22, %c0_23] : memref<8x32xf32, #tpu.memory_space<vmem>>, vector<8x32xf32>
      %c0_24 = arith.constant 0 : index
      %c0_25 = arith.constant 0 : index
      %37 = vector.load %arg7[%c0_24, %c0_25] : memref<8x32xf32, #tpu.memory_space<vmem>>, vector<8x32xf32>
      tpu.vector_store %arg7[%c0_24, %c0_25], %36 {strides = array<i32>} : memref<8x32xf32, #tpu.memory_space<vmem>>, vector<8x32xf32>,
    } else {
    }
    %c0 = arith.constant 0 : index
    %c0_1 = arith.constant 0 : index
    %3 = vector.load %arg4[%c0, %c0_1] : memref<32x128xf32, #tpu.memory_space<vmem>>, vector<32x128xf32>
    %c0_2 = arith.constant 0 : index
    %c0_3 = arith.constant 0 : index
    %4 = vector.load %arg6[%c0_2, %c0_3] : memref<8x32xf32, #tpu.memory_space<vmem>>, vector<8x32xf32>
    %c0_4 = arith.constant 0 : index
    %c0_5 = arith.constant 0 : index
    %5 = vector.load %arg7[%c0_4, %c0_5] : memref<8x32xf32, #tpu.memory_space<vmem>>, vector<8x32xf32>
    %c0_i32_6 = arith.constant 0 : i32
    %cst = arith.constant dense<0.000000e+00> : vector<8x128xf32>
    %6 = tpu.matmul %4, %3, %cst {dimension_numbers = #tpu.dot_dimension_numbers<[1], [0], [0], [1], [0, 0, 1, 1], [], []>} : vector<8x32xf32>, vector<32x128xf32>, vector<8x128xf32> -> vector<8x128xf32>
    %7 = arith.index_cast %c0_i32_6 : i32 to index
    %c0_7 = arith.constant 0 : index
    %c0_8 = arith.constant 0 : index
    %8 = vector.load %arg1[%7, %c0_7, %c0_8] : memref<1x8x128xf32, #tpu.memory_space<vmem>>, vector<1x8x128xf32>
    %9 = vector.shape_cast %8 : vector<1x8x128xf32> to vector<8x128xf32>
    %10 = arith.addf %6, %9 : vector<8x128xf32>
    %11 = arith.negf %10 : vector<8x128xf32>
    %12 = math.exp %11 : vector<8x128xf32>
    %cst_9 = arith.constant 1.000000e+00 : f32
    %13 = vector.broadcast %cst_9 : f32 to vector<8x128xf32>
    %14 = arith.addf %13, %12 : vector<8x128xf32>
    %15 = arith.divf %13, %14 : vector<8x128xf32>
    %16 = vector.extract_strided_slice %15 {offsets = [0, 0], sizes = [8, 32], strides = [1, 1]} : vector<8x128xf32> to vector<8x32xf32>
    %17 = vector.extract_strided_slice %15 {offsets = [0, 32], sizes = [8, 32], strides = [1, 1]} : vector<8x128xf32> to vector<8x32xf32>
    %18 = vector.extract_strided_slice %15 {offsets = [0, 64], sizes = [8, 32], strides = [1, 1]} : vector<8x128xf32> to vector<8x32xf32>
    %19 = vector.extract_strided_slice %15 {offsets = [0, 96], sizes = [8, 32], strides = [1, 1]} : vector<8x128xf32> to vector<8x32xf32>
    %cst_10 = arith.constant 2.000000e+00 : f32
    %20 = vector.broadcast %cst_10 : f32 to vector<8x32xf32>
    %21 = arith.mulf %20, %19 : vector<8x32xf32>
    %cst_11 = arith.constant 1.000000e+00 : f32
    %22 = vector.broadcast %cst_11 : f32 to vector<8x32xf32>
    %23 = arith.subf %21, %22 : vector<8x32xf32>
    %24 = arith.mulf %17, %5 : vector<8x32xf32>
    %25 = arith.mulf %16, %23 : vector<8x32xf32>
    %26 = arith.addf %24, %25 : vector<8x32xf32>
    %27 = math.tanh %26 : vector<8x32xf32>
    %28 = arith.mulf %18, %27 : vector<8x32xf32>
    %c1_i32 = arith.constant 1 : i32
    %c0_12 = arith.constant 0 : index
    %c0_13 = arith.constant 0 : index
    %29 = vector.load %arg6[%c0_12, %c0_13] : memref<8x32xf32, #tpu.memory_space<vmem>>, vector<8x32xf32>
    tpu.vector_store %arg6[%c0_12, %c0_13], %28 {strides = array<i32>} : memref<8x32xf32, #tpu.memory_space<vmem>>, vector<8x32xf32>,
    %c0_14 = arith.constant 0 : index
    %c0_15 = arith.constant 0 : index
    %30 = vector.load %arg7[%c0_14, %c0_15] : memref<8x32xf32, #tpu.memory_space<vmem>>, vector<8x32xf32>
    tpu.vector_store %arg7[%c0_14, %c0_15], %26 {strides = array<i32>} : memref<8x32xf32, #tpu.memory_space<vmem>>, vector<8x32xf32>,
    %c0_i32_16 = arith.constant 0 : i32
    %31 = arith.cmpi eq, %arg0, %c0_i32_16 : i32
    %32 = arith.extui %31 : i1 to i32
    %c0_i32_17 = arith.constant 0 : i32
    %33 = arith.cmpi ne, %32, %c0_i32_17 : i32
    scf.if %33 {
      %34 = tpu.concatenate %28, %26 in 1 : vector<8x32xf32>, vector<8x32xf32> -> vector<8x64xf32>
      %c0_18 = arith.constant 0 : index
      %c0_19 = arith.constant 0 : index
      %35 = vector.load %arg5[%c0_18, %c0_19] : memref<8x64xf32, #tpu.memory_space<vmem>>, vector<8x64xf32>
      tpu.vector_store %arg5[%c0_18, %c0_19], %34 {strides = array<i32>} : memref<8x64xf32, #tpu.memory_space<vmem>>, vector<8x64xf32>,
    } else {
    }
    return
  }
  func.func @transform_0(%arg0: i32) -> (i32, i32, i32) {
    %c0_i32 = arith.constant 0 : i32
    %c0_i32_0 = arith.constant 0 : i32
    %c0_i32_1 = arith.constant 0 : i32
    return %arg0, %c0_i32, %c0_i32_0 : i32, i32, i32
  }
  func.func @transform_1(%arg0: i32) -> (i32, i32) {
    %c0_i32 = arith.constant 0 : i32
    %c0_i32_0 = arith.constant 0 : i32
    %c0_i32_1 = arith.constant 0 : i32
    return %c0_i32, %c0_i32_0 : i32, i32
  }
  func.func @transform_2(%arg0: i32) -> (i32, i32) {
    %c0_i32 = arith.constant 0 : i32
    %c0_i32_0 = arith.constant 0 : i32
    %c0_i32_1 = arith.constant 0 : i32
    return %c0_i32, %c0_i32_0 : i32, i32
  }
  func.func @transform_3(%arg0: i32) -> (i32, i32) {
    %c0_i32 = arith.constant 0 : i32
    %c0_i32_0 = arith.constant 0 : i32
    %c0_i32_1 = arith.constant 0 : i32
    return %c0_i32, %c0_i32_0 : i32, i32
  }
  func.func @transform_4(%arg0: i32) -> (i32, i32) {
    %c0_i32 = arith.constant 0 : i32
    %c0_i32_0 = arith.constant 0 : i32
    %c0_i32_1 = arith.constant 0 : i32
    return %c0_i32, %c0_i32_0 : i32, i32
  }
}

</mosaic_0001>

<bundles_post_ra>
// kernel: my_lstm_sequence.1
= control target key start
LH: loop header
LB: loop body
LE: loop exit
PB: predicated region body
PF: predicated region fallthrough
CT: control target
= control target key end

     0   :  { %vm22_vm0 = vcmask 261120   ;;  %v193_v0 = vmov 0.0|0.0   ;;  %vm194_vm1 = vmmov 0   ;;  %v195_v4 = vmov 0.0   ;;  %s254_s3 = inlined_call_operand.vmem [shape: f32[32,128], index: 3, kind: input, shape index: {}]   ;;  %s255_s1 = inlined_call_operand.vmem [shape: f32[8,32], index: 1, kind: input, shape index: {}]   ;;  %s256_s2 = inlined_call_operand.vmem [shape: f32[8,32], index: 2, kind: input, shape index: {}]   ;;  %s257_s0 = inlined_call_operand.vmem [shape: f32[1,8,128], index: 0, kind: input, shape index: {}]   ;;  %s258_s4 = inlined_call_operand.vmem [shape: f32[8,64], index: 4, kind: output, shape index: {}]  }
   0x1   :  { %175 = vmatprep.subr.bf16.mxu0 %v193_v0  ;;  %v26_v1 = vld [vmem:[%s254_s3] sm:$0xff]  ;;  %v27_v2 = vld [vmem:[%s254_s3 + $0x8] sm:$0xff]  ;;  %v28_v3 = vld [vmem:[%s254_s3 + $0x10] sm:$0xff]  ;;  %172 = vmatprep.mubr.msk.f32.mxu0 %vm194_vm1, %v195_v4  ;;  %vm150_vm2 = vcmask 523264  }
   0x2   :  { %v176_v5 = vpack.c.bf16 %v27_v2, %v26_v1  ;;  %v29_v6 = vld [vmem:[%s254_s3 + $0x18] sm:$0xff]  ;;  %v21_v7 = vld [vmem:[%s255_s1] sm:$0xff]  ;;  %s196_s1 = smov 32  }
   0x3   :  { %v24_v8 = vld [vmem:[%s256_s2] sm:$0xff]  ;;  %23 = vst.msk [vmem:[#allocation2] sm:$0xff] %vm22_vm0, %v21_v7  ;;  %v179_v9 = vpack.c.bf16 %v29_v6, %v28_v3  ;;  %s198_s2 = smov 64  }
   0x4   :  { %25 = vst.msk [vmem:[#allocation3] sm:$0xff] %vm22_vm0, %v24_v8  ;;  %177 = vmatpush3.bf16.msra.mxu0 %v176_v5  ;;  %v32_v11 = vld [vmem:[%s257_s0] sm:$0xff]  ;;  %s197_s0 = smov 96  }
   0x5   :  { %178 = vmatprep.subr.bf16.mxu0 %v193_v0 }
   0x8   :  { %180 = vmatpush3.bf16.msra.mxu0 %v179_v9 }
   0xa   :  { %v30_v10 = vld [vmem:[#allocation2] sm:$0xff] }
   0xb   :  { %173 = vmatmul.mubr.msk.f32.vlgmr.msra.gmra.mrb[0].mxu0 %vm22_vm0, %v30_v10  ;;  %v31_v21 = vld [vmem:[#allocation3] sm:$0xff] }
  0xde   :  { %v103_v12 = vpop.f32.mrb[0].mxu0 }
  0xdf   :  { %v104_v13 = vadd.f32 %v103_v12, %v32_v11  ;;  %v174_v14 = vpop.f32.mrb[1].mxu0 }
  0xe1   :  { %v157_v15 = vmul.f32 -1.442695, %v104_v13 }
  0xe3   :  { %187 = vpow2.f32 %v157_v15 }
  0xed   :  { %v188_v16 = vpop.eup %187 }
  0xee   :  { %v110_v17 = vadd.f32 1.0, %v188_v16 }
  0xf0   :  { %189 = vrcp.f32 %v110_v17 }
  0xfa   :  { %v190_v18 = vpop.eup %189 }
  0xfb   :  { %v113_v19 = vmul.f32 2.0, %v190_v18 }
  0xfd   :  { %v158_v20 = vadd.f32 -1.0, %v113_v19 }
  0xff   :  { %121 = vrot.lane.b32.xlu0 %v158_v20, %s196_s1 }
 0x103   :  { %116 = vrot.lane.b32.xlu0 %v31_v21, %s196_s1 }
 0x171   :  { %v122_v22 = vpop.permute.xlu0 %121 }
 0x172   :  { %v124_v23 = vmul.f32 %v190_v18, %v122_v22 }
 0x174   :  { %126 = vrot.lane.b32.xlu1 %v124_v23, %s196_s1 }
 0x175   :  { %v117_v24 = vpop.permute.xlu0 %116 }
 0x176   :  { %v119_v25 = vmul.f32 %v190_v18, %v117_v24 }
 0x1e6   :  { %v127_v26 = vpop.permute.xlu1 %126 }
 0x1e7   :  { %v129_v27 = vadd.f32 %v127_v26, %v119_v25 }
 0x1e9   :  { %191 = vtanh.f32 %v129_v27 }
 0x1f3   :  { %v192_v28 = vpop.eup %191 }
 0x1f4   :  { %132 = vrot.lane.b32.xlu1 %v192_v28, %s196_s1 }
 0x1f8   :  { %142 = vrot.lane.b32.xlu1 %v129_v27, %s197_s0 }
 0x266   :  { %v133_v29 = vpop.permute.xlu1 %132 }
 0x267   :  { %v135_v30 = vmul.f32 %v190_v18, %v133_v29 }
 0x269   :  { %137 = vrot.lane.b32.xlu0 %v135_v30, %s198_s2 }
 0x26a   :  { %v143_v31 = vpop.permute.xlu1 %142 }
 0x26b   :  { %145 = vst.msk [vmem:[#allocation3] sm:$0xff] %vm22_vm0, %v143_v31 }
 0x2db   :  { %v138_v32 = vpop.permute.xlu0 %137 }
 0x2dc   :  { %140 = vst.msk [vmem:[#allocation2] sm:$0xff] %vm22_vm0, %v138_v32  ;;  %v149_v33 = vsel %vm22_vm0, %v138_v32, %v129_v27 }
 0x2dd   :  { %151 = vst.msk [vmem:[%s258_s4] sm:$0xff] %vm150_vm2, %v149_v33 }

</bundles_post_ra>
